<compile_context>
chip_gen: v6e
topology: v6e:2x2x1
jax: 0.10.0
libtpu: 0.0.40
codegen_flags: <defaults>
</compile_context>

<pallas_src>
import functools

import jax
import jax.numpy as jnp
from jax.experimental import pallas as pl
from jax.experimental.pallas import tpu as pltpu


_SUBLANE_FOR_ITEMSIZE = {4: 8, 2: 16, 1: 32}


def _round_up(x, m):
    return ((x + m - 1) // m) * m


@functools.lru_cache(maxsize=None)
def _vmem_capacity_bytes():
    try:
        return int(pltpu.get_tpu_info().vmem_capacity_bytes)
    except Exception:
        return 64 * 1024 * 1024  # conservative fallback (v7x per-core VMEM)


def _weighted_features_kernel(a_ref, b_ref, dw_ref, db_ref, out_ref):
    a = a_ref[...]                                   # (tb, F), native dtype
    b = b_ref[...]                                   # (tb, F)

    # Logit difference l0 - l1 per row, accumulated in f32 (VPU mul/add +
    # XLU lane reduction).  Mosaic masks padded lanes of a non-128-multiple F.
    prod = (a.astype(jnp.float32) * dw_ref[0:1, :]
            + b.astype(jnp.float32) * dw_ref[1:2, :])            # (tb, F) f32
    ld = jnp.sum(prod, axis=-1, keepdims=True) + db_ref[0, 0]    # (tb, 1) f32

    # 2-way softmax weight for A is exactly sigmoid(l0 - l1)  (EUP op).
    w0 = jax.nn.sigmoid(ld).astype(a.dtype)                      # (tb, 1)

    # out = w0*A + (1-w0)*B = B + w0*(A - B), blended in the native dtype.
    out_ref[...] = (b + w0 * (a - b)).astype(out_ref.dtype)


@functools.partial(jax.jit, static_argnames=("block_batch",))
def weighted_features(A, B, W, bias, *, block_batch=None):
    """A, B: (batch, F). W: (2, 2F) PyTorch Linear weight. bias: (2,)."""
    batch, feat = A.shape
    assert B.shape == (batch, feat)
    itemsize = jnp.dtype(A.dtype).itemsize
    sublane = _SUBLANE_FOR_ITEMSIZE.get(itemsize, 8)

    # Per-row VMEM footprint: double-buffered A/B/out tiles plus ~4 tile-sized
    # in-kernel temporaries (f32-width).
    tmp_itemsize = max(itemsize, 4)
    per_row = max(1, feat) * (2 * 3 * itemsize + 4 * tmp_itemsize)

    if block_batch is None:
        # Working-set budget: ~2/3 of this generation's VMEM (64 MiB on v7x,
        # 128 MiB on v5e/v6e), leaving headroom for compiler scratch.
        budget = (2 * _vmem_capacity_bytes()) // 3
        block_batch = max(sublane, (budget // per_row) // sublane * sublane)
        # Keep several grid steps for pipelining / megacore when batch allows.
        target_steps = 4
        if batch >= target_steps * sublane:
            block_batch = min(block_batch,
                              _round_up(pl.cdiv(batch, target_steps), sublane))
    block_batch = max(sublane, _round_up(int(block_batch), sublane))
    block_batch = min(block_batch, _round_up(batch, sublane))

    grid = (pl.cdiv(batch, block_batch),)

    # Pre-reduce the Linear(2F, 2) to logit-difference weights (lane-dense).
    Wf = W.astype(jnp.float32)
    bias_f = bias.astype(jnp.float32)
    dw = jnp.stack([Wf[0, :feat] - Wf[1, :feat],
                    Wf[0, feat:] - Wf[1, feat:]])                # (2, F) f32
    db = (bias_f[0] - bias_f[1]).reshape(1, 1)                   # (1, 1) f32

    tile_bytes = 2 * 3 * block_batch * feat * itemsize           # A/B/out, 2-deep
    tmp_bytes = 4 * block_batch * feat * tmp_itemsize            # kernel temps
    weight_bytes = 2 * 2 * feat * 4                              # dw, 2-deep
    vmem_limit = tile_bytes + tmp_bytes + weight_bytes + 4 * 1024 * 1024
    vmem_limit = min(max(32 * 1024 * 1024, vmem_limit), _vmem_capacity_bytes())

    out = pl.pallas_call(
        _weighted_features_kernel,
        out_shape=jax.ShapeDtypeStruct((batch, feat), A.dtype),
        grid_spec=pltpu.PrefetchScalarGridSpec(
            num_scalar_prefetch=0,
            grid=grid,
            in_specs=[
                pl.BlockSpec((block_batch, feat), lambda i: (i, 0)),   # A
                pl.BlockSpec((block_batch, feat), lambda i: (i, 0)),   # B
                pl.BlockSpec((2, feat), lambda i: (0, 0)),             # dw
                pl.BlockSpec(memory_space=pltpu.MemorySpace.SMEM),     # db
            ],
            out_specs=pl.BlockSpec((block_batch, feat), lambda i: (i, 0)),
        ),
        compiler_params=pltpu.CompilerParams(
            # TODO(synk): switch the batch axis to pltpu.CORE_PARALLEL on v7x
            # once verified across generations; "parallel" is safe everywhere.
            dimension_semantics=("parallel",),
            vmem_limit_bytes=int(vmem_limit),
        ),
    )(A, B, dw, db)
    return out


def _reference(A, B, W, bias):
    combined = jnp.concatenate((A, B), axis=1)
    logits = combined @ W.T + bias
    w = jax.nn.softmax(logits, axis=1)
    return w[:, 0:1] * A + w[:, 1:2] * B


if __name__ == "__main__":
    key = jax.random.PRNGKey(0)
    batch, feature_size = 8, 32

    kA, kB, kW, kb = jax.random.split(key, 4)
    A = jax.random.normal(kA, (batch, feature_size), dtype=jnp.float32)
    B = jax.random.normal(kB, (batch, feature_size), dtype=jnp.float32)

    # Deterministic Linear(2F, 2) init (uniform in +-1/sqrt(fan_in), like PyTorch).
    bound = 1.0 / jnp.sqrt(2.0 * feature_size)
    W = jax.random.uniform(kW, (2, 2 * feature_size),
                           minval=-bound, maxval=bound, dtype=jnp.float32)
    bias = jax.random.uniform(kb, (2,), minval=-bound, maxval=bound,
                              dtype=jnp.float32)

    out = jax.block_until_ready(weighted_features(A, B, W, bias))
    ref = _reference(A, B, W, bias)
    assert out.shape == (batch, feature_size)
    assert jnp.allclose(out, ref, atol=1e-5, rtol=1e-5), "mismatch vs reference"

    # Ragged batch (exercises the partial-last-block path; no wrapper padding).
    A2, B2 = A[:5], B[:5]
    out2 = jax.block_until_ready(weighted_features(A2, B2, W, bias))
    ref2 = _reference(A2, B2, W, bias)
    assert out2.shape == (5, feature_size)
    assert jnp.allclose(out2, ref2, atol=1e-5, rtol=1e-5), "ragged mismatch"

    print("KERNEL_OK")
</pallas_src>

<mosaic_0001>
module attributes {stable_mosaic.version = 11 : i64} {
  func.func @_weighted_features_kernel(%arg0: i32, %arg1: memref<8x32xf32, #tpu.memory_space<vmem>>, %arg2: memref<8x32xf32, #tpu.memory_space<vmem>>, %arg3: memref<2x32xf32, #tpu.memory_space<vmem>>, %arg4: memref<1x1xf32, #tpu.memory_space<smem>>, %arg5: memref<8x32xf32, #tpu.memory_space<vmem>>) attributes {dimension_semantics = [#tpu.dimension_semantics<parallel>], iteration_bounds = array<i64: 1>, scalar_prefetch = 0 : i64, scratch_operands = 0 : i64, tpu.core_type = #tpu.core_type<tc>, window_params = [{transform_indices = @transform_0, window_bounds = array<i64: 8, 32>}, {transform_indices = @transform_1, window_bounds = array<i64: 8, 32>}, {pipeline_mode = #tpu.pipeline_mode<synchronous>, transform_indices = @transform_2, window_bounds = array<i64: 2, 32>}, {transform_indices = @transform_3, window_bounds = array<i64: 1, 1>}, {transform_indices = @transform_4, window_bounds = array<i64: 8, 32>}]} {
    %c0 = arith.constant 0 : index
    %c0_0 = arith.constant 0 : index
    %0 = vector.load %arg1[%c0, %c0_0] : memref<8x32xf32, #tpu.memory_space<vmem>>, vector<8x32xf32>
    %c0_1 = arith.constant 0 : index
    %c0_2 = arith.constant 0 : index
    %1 = vector.load %arg2[%c0_1, %c0_2] : memref<8x32xf32, #tpu.memory_space<vmem>>, vector<8x32xf32>
    %c0_3 = arith.constant 0 : index
    %c0_4 = arith.constant 0 : index
    %2 = vector.load %arg3[%c0_3, %c0_4] : memref<2x32xf32, #tpu.memory_space<vmem>>, vector<1x32xf32>
    %3 = vector.broadcast %2 : vector<1x32xf32> to vector<8x32xf32>
    %4 = arith.mulf %0, %3 : vector<8x32xf32>
    %c1 = arith.constant 1 : index
    %c0_5 = arith.constant 0 : index
    %5 = vector.load %arg3[%c1, %c0_5] : memref<2x32xf32, #tpu.memory_space<vmem>>, vector<1x32xf32>
    %6 = vector.broadcast %5 : vector<1x32xf32> to vector<8x32xf32>
    %7 = arith.mulf %1, %6 : vector<8x32xf32>
    %8 = arith.addf %4, %7 : vector<8x32xf32>
    %cst = arith.constant dense<0.000000e+00> : vector<8xf32>
    %9 = vector.multi_reduction <add>, %8, %cst [1] : vector<8x32xf32> to vector<8xf32>
    %10 = vector.shape_cast %9 : vector<8xf32> to vector<8x1xf32>
    %c0_6 = arith.constant 0 : index
    %c0_7 = arith.constant 0 : index
    %11 = memref.load %arg4[%c0_6, %c0_7] : memref<1x1xf32, #tpu.memory_space<smem>>
    %12 = vector.broadcast %11 : f32 to vector<8x1xf32>
    %13 = arith.addf %10, %12 : vector<8x1xf32>
    %14 = arith.negf %13 : vector<8x1xf32>
    %15 = math.exp %14 : vector<8x1xf32>
    %cst_8 = arith.constant 1.000000e+00 : f32
    %16 = vector.broadcast %cst_8 : f32 to vector<8x1xf32>
    %17 = arith.addf %16, %15 : vector<8x1xf32>
    %18 = arith.divf %16, %17 : vector<8x1xf32>
    %19 = arith.subf %0, %1 : vector<8x32xf32>
    %20 = vector.broadcast %18 : vector<8x1xf32> to vector<8x32xf32>
    %21 = arith.mulf %20, %19 : vector<8x32xf32>
    %22 = arith.addf %1, %21 : vector<8x32xf32>
    %c0_9 = arith.constant 0 : index
    %c0_10 = arith.constant 0 : index
    %23 = vector.load %arg5[%c0_9, %c0_10] : memref<8x32xf32, #tpu.memory_space<vmem>>, vector<8x32xf32>
    tpu.vector_store %arg5[%c0_9, %c0_10], %22 {strides = array<i32>} : memref<8x32xf32, #tpu.memory_space<vmem>>, vector<8x32xf32>,
    return
  }
  func.func @transform_0(%arg0: i32) -> (i32, i32) {
    %c0_i32 = arith.constant 0 : i32
    %c0_i32_0 = arith.constant 0 : i32
    return %arg0, %c0_i32 : i32, i32
  }
  func.func @transform_1(%arg0: i32) -> (i32, i32) {
    %c0_i32 = arith.constant 0 : i32
    %c0_i32_0 = arith.constant 0 : i32
    return %arg0, %c0_i32 : i32, i32
  }
  func.func @transform_2(%arg0: i32) -> (i32, i32) {
    %c0_i32 = arith.constant 0 : i32
    %c0_i32_0 = arith.constant 0 : i32
    %c0_i32_1 = arith.constant 0 : i32
    return %c0_i32, %c0_i32_0 : i32, i32
  }
  func.func @transform_3(%arg0: i32) -> (i32, i32) {
    %c0_i32 = arith.constant 0 : i32
    %c0_i32_0 = arith.constant 0 : i32
    %c0_i32_1 = arith.constant 0 : i32
    return %c0_i32, %c0_i32_0 : i32, i32
  }
  func.func @transform_4(%arg0: i32) -> (i32, i32) {
    %c0_i32 = arith.constant 0 : i32
    %c0_i32_0 = arith.constant 0 : i32
    return %arg0, %c0_i32 : i32, i32
  }
}

</mosaic_0001>

<bundles_post_ra>
// kernel: weighted_features.1
= control target key start
LH: loop header
LB: loop body
LE: loop exit
PB: predicated region body
PF: predicated region fallthrough
CT: control target
= control target key end

     0   :  { %s141_s0 = inlined_call_operand.vmem [shape: f32[8,32], index: 0, kind: input, shape index: {}]   ;;  %s142_s1 = inlined_call_operand.vmem [shape: f32[8,32], index: 1, kind: input, shape index: {}]   ;;  %s143_s2 = inlined_call_operand.vmem [shape: f32[2,32], index: 2, kind: input, shape index: {}]   ;;  %s144_s3 = inlined_call_operand.<no memory space> [shape: f32[1,1], index: 3, kind: input, shape index: {}]   ;;  %s145_s4 = inlined_call_operand.hbm [shape: f32[8,32], index: 4, kind: output, shape index: {}]  }
   0x1   :  { %v19_v0 = vld [vmem:[%s141_s0] sm:$0xff] }
   0x2   :  { %v20_v1 = vld [vmem:[%s142_s1] sm:$0xff] }
   0x3   :  { %v65_v2 = vld [vmem:[%s143_s2] ss:$0 sm:$0xff]  ;;  %v66_v4 = vld [vmem:[%s143_s2 + $0x1] ss:$0 sm:$0xff] }
   0x4   :  { %v26_v3 = vmul.f32 %v65_v2, %v19_v0 }
   0x5   :  { %10 = vsyncpa [#allocation4], 0  ;;  %v32_v5 = vmul.f32 %v66_v4, %v20_v1  ;;  %vm34_vm0 = vcmask 261120   ;;  %v39_v8 = vstv %s144_s3  ;;  %v47_v14 = vsub.f32 %v19_v0, %v20_v1  ;;  %s95_s1 = smov [#allocation3]  }
   0x6   :  { %s57_s2 = sshll.u32 %s95_s1, 4  ;;  %s58_s2 = int_to_ptr.vmem [resolvable:$true] %s57_s2 }
   0x7   :  { %v33_v6 = vadd.f32 %v32_v5, %v26_v3  ;;  %s73_s24 = scalar_lea.vmem %s58_s2, 128  ;;  %p78_p1 = scmp.lt.s32.totalorder %s58_s2, %s58_s2 }
   0x8   :  { %p74_p0 = scmp.ne.s32.totalorder %s58_s2, %s73_s24  ;;  %p79_p2 = scmp.lt.s32.totalorder %s73_s24, %s73_s24 }
   0x9   :  { %v35_v7 = vsel %vm34_vm0, %v33_v6, 0.0 }
   0xa   :  { %36 = vadd.xlane.f32.xlu0 %v35_v7  ;;  %p80_p3 = por %p79_p2, %p78_p1 }
   0xc   :  { %p81_p4 = pnand %p80_p3, %p74_p0 }
  0x93   :  { %v37_v9 = vpop.xlane.xlu0 %36 }
  0x94   :  { %v40_v10 = vadd.f32 %v39_v8, %v37_v9 }
  0x96   :  { %v67_v11 = vmul.f32 -1.442695, %v40_v10 }
  0x98   :  { %69 = vpow2.f32 %v67_v11 }
  0xa5   :  { %v70_v12 = vpop.eup %69 }
  0xa6   :  { %v44_v13 = vadd.f32 1.0, %v70_v12 }
  0xa8   :  { %71 = vrcp.f32 %v44_v13 }
  0xb5   :  { %v72_v15 = vpop.eup %71 }
  0xb6   :  { %v48_v16 = vmul.f32 %v72_v15, %v47_v14 }
  0xb8   :  { %v49_v17 = vadd.f32 %v48_v16, %v20_v1 }
  0xba   :  { %50 = vst.msk [vmem:[#allocation3] sm:$0xff] %vm34_vm0, %v49_v17 }
  0xbb   :  { %84 = shalt.err (!%p81_p4)
}
  0xbc   :  { %60 = dma.vmem_to_hbm [thread:$0]  %s58_s2, 128, %s145_s4, [#allocation4]  }
  0xbd   :  { %93 = dma.done.wait [#allocation4], 128  }
  0xbe   :  { %94 = vsyncadd [#allocation4], 4294967168 }
  0xbf   :  { %64 = vsyncpa [#allocation4], 1 }

</bundles_post_ra>
